<compile_context>
chip_gen: v7x
topology: tpu7x:2x2x1
jax: 0.10.0
libtpu: 0.0.40
codegen_flags: <defaults>
</compile_context>

<pallas_src>
import functools

import jax
import jax.numpy as jnp
from jax import lax
from jax.experimental import pallas as pl
from jax.experimental.pallas import tpu as pltpu


def _round_up(v, m):
    return (v + m - 1) // m * m


def _encoder_kernel(src_ref, dst_ref,            # scalar prefetch (SMEM int32 [E_pad])
                    x_ref, w_ref, b_ref,         # inputs
                    out_ref,                     # output (resident accumulator)
                    h_ref, kd_ref, qv_ref,       # VMEM scratch
                    *, c_pad, tile_e, n_layers):
    l = pl.program_id(0)                         # layer index
    t = pl.program_id(1)                         # edge-tile index
    n_tiles = pl.num_programs(1)

    # ---- per-layer prologue: fused node linears on the MXU ---------------
    @pl.when(t == 0)
    def _():
        @pl.when(l == 0)
        def _():
            h_ref[...] = x_ref[...]              # load (padded) input features

        # one matmul for key|query|value|skip, bf16 operands, f32 accumulate
        xw = jnp.dot(h_ref[...].astype(jnp.bfloat16), w_ref[...],
                     preferred_element_type=jnp.float32) + b_ref[...]
        kd_ref[...] = xw[:, :c_pad]              # k + bk          (dst side)
        qv_ref[...] = xw[:, c_pad:3 * c_pad]     # [q+bq | v+bv]   (src side)
        out_ref[...] = xw[:, 3 * c_pad:]         # skip + bias  (accumulator init)

    # ---- edge tile: gather -> gate -> scatter-add -------------------------
    base = t * tile_e

    def body(i, carry):
        e = base + i
        j = src_ref[e]                           # source node
        d = dst_ref[e]                           # target node
        qv = qv_ref[pl.ds(j, 1), :]              # [1, 2*C]
        kd = kd_ref[pl.ds(d, 1), :]              # [1, C]
        gate = jax.nn.sigmoid(kd + qv[:, :c_pad])
        msg = gate * qv[:, c_pad:]
        out_ref[pl.ds(d, 1), :] = out_ref[pl.ds(d, 1), :] + msg
        return carry

    lax.fori_loop(0, tile_e, body, 0)

    # ---- per-layer epilogue: relu + L2 normalize (all but last layer) -----
    @pl.when(t == n_tiles - 1)
    def _():
        @pl.when(l < n_layers - 1)
        def _():
            h = jnp.maximum(out_ref[...], 0.0)
            ssq = jnp.sum(h * h, axis=-1, keepdims=True)
            h_ref[:, 0:c_pad] = h * lax.rsqrt(jnp.maximum(ssq, 1e-24))


def res_gated_conv_encoder(x, edge_index, edge_feature, layer_params, *, tile_e=256):
    """ResGatedConvEncoder.forward (edge_feature accepted but unused)."""
    del edge_feature
    n, c_in = x.shape
    c_out = layer_params[0]["wk"].shape[1]
    n_layers = len(layer_params)

    c_pad = _round_up(c_out, 128)                       # lane-dense channels
    cin_pad = _round_up(max(c_in, c_out), 128)          # shared input width
    n_pad = _round_up(n + 1, 8)                         # +1 -> dummy scatter row

    # edge lists (indices assumed in-range; PyTorch index_add would error on OOB)
    src = edge_index[0].astype(jnp.int32)
    dst = edge_index[1].astype(jnp.int32)
    e = int(src.shape[0])
    tile_e = min(tile_e, _round_up(max(e, 1), 8))
    e_pad = _round_up(max(e, 1), tile_e)
    dummy = jnp.int32(n_pad - 1)                        # padded edges hit this row
    src_p = jnp.full((e_pad,), dummy, jnp.int32).at[:e].set(src)
    dst_p = jnp.full((e_pad,), dummy, jnp.int32).at[:e].set(dst)

    # padded node features
    x_p = jnp.zeros((n_pad, cin_pad), jnp.float32).at[:n, :c_in].set(
        x.astype(jnp.float32))

    # fuse + pad per-layer weights: [Wk|Wq|Wv|Wskip] -> [cin_pad, 4*c_pad] (bf16),
    # fused bias row [bk|bq|bv|bias] -> [1, 4*c_pad] (f32). Padding is zeros so
    # padded lanes/rows contribute exactly 0.
    w_stk, b_stk = [], []
    for li, p in enumerate(layer_params):
        ci = c_in if li == 0 else c_out
        w = jnp.zeros((cin_pad, 4 * c_pad), jnp.float32)
        b = jnp.zeros((1, 4 * c_pad), jnp.float32)
        pieces = [(p["wk"], p["bk"]), (p["wq"], p["bq"]),
                  (p["wv"], p["bv"]), (p["wskip"], p["bias"])]
        for slot, (wm, bm) in enumerate(pieces):
            w = w.at[:ci, slot * c_pad: slot * c_pad + c_out].set(wm)
            b = b.at[:, slot * c_pad: slot * c_pad + c_out].set(
                bm.reshape(1, c_out))
        w_stk.append(w.astype(jnp.bfloat16))
        b_stk.append(b)
    w_stk = jnp.stack(w_stk)                            # [L, cin_pad, 4*c_pad] bf16
    b_stk = jnp.stack(b_stk)                            # [L, 1, 4*c_pad] f32

    n_tiles = e_pad // tile_e
    kernel = functools.partial(_encoder_kernel, c_pad=c_pad, tile_e=tile_e,
                               n_layers=n_layers)

    grid_spec = pltpu.PrefetchScalarGridSpec(
        num_scalar_prefetch=2,                          # src, dst -> SMEM
        grid=(n_layers, n_tiles),
        in_specs=[
            pl.BlockSpec((n_pad, cin_pad), lambda l, t, s, d: (0, 0)),
            pl.BlockSpec((None, cin_pad, 4 * c_pad), lambda l, t, s, d: (l, 0, 0)),
            pl.BlockSpec((None, 1, 4 * c_pad), lambda l, t, s, d: (l, 0, 0)),
        ],
        out_specs=pl.BlockSpec((n_pad, c_pad), lambda l, t, s, d: (0, 0)),
        scratch_shapes=[
            pltpu.VMEM((n_pad, cin_pad), jnp.float32),      # h  (layer input)
            pltpu.VMEM((n_pad, c_pad), jnp.float32),        # k + bk
            pltpu.VMEM((n_pad, 2 * c_pad), jnp.float32),    # [q+bq | v+bv]
        ],
    )

    out_pad = pl.pallas_call(
        kernel,
        grid_spec=grid_spec,
        out_shape=jax.ShapeDtypeStruct((n_pad, c_pad), jnp.float32),
        compiler_params=pltpu.CompilerParams(
            dimension_semantics=("arbitrary", "arbitrary")),
    )(src_p, dst_p, x_p, w_stk, b_stk)

    return out_pad[:n, :c_out]


def _init_layer_params(key, c_in, c_out):
    ks = jax.random.split(key, 5)
    scale = 1.0 / jnp.sqrt(jnp.float32(c_in))

    def lin(k):
        return scale * jax.random.normal(k, (c_in, c_out), jnp.float32)

    return {
        "wk": lin(ks[0]), "bk": jnp.zeros((1, c_out), jnp.float32),
        "wq": lin(ks[1]), "bq": jnp.zeros((1, c_out), jnp.float32),
        "wv": lin(ks[2]), "bv": jnp.zeros((1, c_out), jnp.float32),
        "wskip": lin(ks[3]),                     # root/skip linear, no bias
        "bias": 0.01 * jax.random.normal(ks[4], (1, c_out), jnp.float32),
    }


def _reference(x, src, dst, layer_params):
    """Pure-JAX f32 reference of the same forward, for a sanity check."""
    def conv(x, p):
        k = x @ p["wk"] + p["bk"]
        q = x @ p["wq"] + p["bq"]
        v = x @ p["wv"] + p["bv"]
        gate = jax.nn.sigmoid(k[dst] + q[src])
        msg = gate * v[src]
        agg = jnp.zeros((x.shape[0], k.shape[1]), jnp.float32).at[dst].add(msg)
        return agg + x @ p["wskip"] + p["bias"]

    for p in layer_params[:-1]:
        x = conv(x, p)
        x = jnp.maximum(x, 0.0)
        x = x / jnp.maximum(jnp.linalg.norm(x, axis=-1, keepdims=True), 1e-12)
    return conv(x, layer_params[-1])


if __name__ == "__main__":
    key = jax.random.PRNGKey(0)
    N, C_IN, C_OUT, N_LAYERS = 8, 4, 32, 2

    k_x, k_ef, *k_layers = jax.random.split(key, 2 + N_LAYERS)
    x = jax.random.normal(k_x, (N, C_IN), jnp.float32)

    # deterministic bidirectional ring graph: E = 2 * N = 16 edges
    fwd_src = jnp.arange(N, dtype=jnp.int32)
    fwd_dst = (fwd_src + 1) % N
    src = jnp.concatenate([fwd_src, fwd_dst])
    dst = jnp.concatenate([fwd_dst, fwd_src])
    edge_index = jnp.stack([src, dst], axis=0)                      # [2, 16]
    edge_feature = jax.random.normal(k_ef, (src.shape[0], C_IN))    # unused

    layer_params = [_init_layer_params(k_layers[0], C_IN, C_OUT)]
    for i in range(1, N_LAYERS):
        layer_params.append(_init_layer_params(k_layers[i], C_OUT, C_OUT))

    out = res_gated_conv_encoder(x, edge_index, edge_feature, layer_params)
    out = jax.block_until_ready(out)

    ref = _reference(x, src, dst, layer_params)
    assert out.shape == (N, C_OUT)
    # bf16 MXU operands (f32 accumulate) -> slightly relaxed tolerance vs f32 ref
    assert jnp.allclose(out, ref, rtol=2e-2, atol=2e-2), "mismatch vs reference"

    print("KERNEL_OK")
</pallas_src>

<mosaic_0001>
module attributes {stable_mosaic.version = 11 : i64} {
  func.func @_encoder_kernel(%arg0: i32, %arg1: i32, %arg2: memref<16xi32, #tpu.memory_space<smem>>, %arg3: memref<16xi32, #tpu.memory_space<smem>>, %arg4: memref<16x128xf32, #tpu.memory_space<vmem>>, %arg5: memref<1x128x512xbf16, #tpu.memory_space<vmem>>, %arg6: memref<1x1x512xf32, #tpu.memory_space<vmem>>, %arg7: memref<16x128xf32, #tpu.memory_space<vmem>>, %arg8: memref<16x128xf32, #tpu.memory_space<vmem>>, %arg9: memref<16x128xf32, #tpu.memory_space<vmem>>, %arg10: memref<16x256xf32, #tpu.memory_space<vmem>>) attributes {dimension_semantics = [#tpu.dimension_semantics<arbitrary>, #tpu.dimension_semantics<arbitrary>], iteration_bounds = array<i64: 2, 1>, scalar_prefetch = 2 : i64, scratch_operands = 3 : i64, tpu.core_type = #tpu.core_type<tc>, window_params = [{pipeline_mode = #tpu.pipeline_mode<synchronous>, transform_indices = @transform_0, window_bounds = array<i64: 16, 128>}, {transform_indices = @transform_1, window_bounds = array<i64: 1, 128, 512>}, {transform_indices = @transform_2, window_bounds = array<i64: 1, 1, 512>}, {pipeline_mode = #tpu.pipeline_mode<synchronous>, transform_indices = @transform_3, window_bounds = array<i64: 16, 128>}]} {
    %c0_i32 = arith.constant 0 : i32
    %0 = arith.cmpi eq, %arg1, %c0_i32 : i32
    %1 = arith.extui %0 : i1 to i32
    %c0_i32_0 = arith.constant 0 : i32
    %2 = arith.cmpi ne, %1, %c0_i32_0 : i32
    scf.if %2 {
      %c0_i32_6 = arith.constant 0 : i32
      %8 = arith.cmpi eq, %arg0, %c0_i32_6 : i32
      %9 = arith.extui %8 : i1 to i32
      %c0_i32_7 = arith.constant 0 : i32
      %10 = arith.cmpi ne, %9, %c0_i32_7 : i32
      scf.if %10 {
        %c0_21 = arith.constant 0 : index
        %c0_22 = arith.constant 0 : index
        %26 = vector.load %arg4[%c0_21, %c0_22] : memref<16x128xf32, #tpu.memory_space<vmem>>, vector<16x128xf32>
        %c0_23 = arith.constant 0 : index
        %c0_24 = arith.constant 0 : index
        %27 = vector.load %arg8[%c0_23, %c0_24] : memref<16x128xf32, #tpu.memory_space<vmem>>, vector<16x128xf32>
        tpu.vector_store %arg8[%c0_23, %c0_24], %26 {strides = array<i32>} : memref<16x128xf32, #tpu.memory_space<vmem>>, vector<16x128xf32>,
      } else {
      }
      %c0 = arith.constant 0 : index
      %c0_8 = arith.constant 0 : index
      %11 = vector.load %arg8[%c0, %c0_8] : memref<16x128xf32, #tpu.memory_space<vmem>>, vector<16x128xf32>
      %12 = arith.truncf %11 : vector<16x128xf32> to vector<16x128xbf16>
      %c0_9 = arith.constant 0 : index
      %c0_10 = arith.constant 0 : index
      %c0_11 = arith.constant 0 : index
      %13 = vector.load %arg5[%c0_9, %c0_10, %c0_11] : memref<1x128x512xbf16, #tpu.memory_space<vmem>>, vector<1x128x512xbf16>
      %14 = vector.shape_cast %13 : vector<1x128x512xbf16> to vector<128x512xbf16>
      %cst = arith.constant dense<0.000000e+00> : vector<16x512xf32>
      %15 = tpu.matmul %12, %14, %cst {dimension_numbers = #tpu.dot_dimension_numbers<[1], [0], [0], [1], [0, 0, 1, 1], [], []>} : vector<16x128xbf16>, vector<128x512xbf16>, vector<16x512xf32> -> vector<16x512xf32>
      %c0_12 = arith.constant 0 : index
      %c0_13 = arith.constant 0 : index
      %c0_14 = arith.constant 0 : index
      %16 = vector.load %arg6[%c0_12, %c0_13, %c0_14] : memref<1x1x512xf32, #tpu.memory_space<vmem>>, vector<1x1x512xf32>
      %17 = vector.shape_cast %16 : vector<1x1x512xf32> to vector<1x512xf32>
      %18 = vector.broadcast %17 : vector<1x512xf32> to vector<16x512xf32>
      %19 = arith.addf %15, %18 : vector<16x512xf32>
      %20 = vector.extract_strided_slice %19 {offsets = [0, 0], sizes = [16, 128], strides = [1, 1]} : vector<16x512xf32> to vector<16x128xf32>
      %c0_15 = arith.constant 0 : index
      %c0_16 = arith.constant 0 : index
      %21 = vector.load %arg9[%c0_15, %c0_16] : memref<16x128xf32, #tpu.memory_space<vmem>>, vector<16x128xf32>
      tpu.vector_store %arg9[%c0_15, %c0_16], %20 {strides = array<i32>} : memref<16x128xf32, #tpu.memory_space<vmem>>, vector<16x128xf32>,
      %22 = vector.extract_strided_slice %19 {offsets = [0, 128], sizes = [16, 256], strides = [1, 1]} : vector<16x512xf32> to vector<16x256xf32>
      %c0_17 = arith.constant 0 : index
      %c0_18 = arith.constant 0 : index
      %23 = vector.load %arg10[%c0_17, %c0_18] : memref<16x256xf32, #tpu.memory_space<vmem>>, vector<16x256xf32>
      tpu.vector_store %arg10[%c0_17, %c0_18], %22 {strides = array<i32>} : memref<16x256xf32, #tpu.memory_space<vmem>>, vector<16x256xf32>,
      %24 = vector.extract_strided_slice %19 {offsets = [0, 384], sizes = [16, 128], strides = [1, 1]} : vector<16x512xf32> to vector<16x128xf32>
      %c0_19 = arith.constant 0 : index
      %c0_20 = arith.constant 0 : index
      %25 = vector.load %arg7[%c0_19, %c0_20] : memref<16x128xf32, #tpu.memory_space<vmem>>, vector<16x128xf32>
      tpu.vector_store %arg7[%c0_19, %c0_20], %24 {strides = array<i32>} : memref<16x128xf32, #tpu.memory_space<vmem>>, vector<16x128xf32>,
    } else {
    }
    %c16_i32 = arith.constant 16 : i32
    %3 = arith.muli %arg1, %c16_i32 : i32
    %c0_i32_1 = arith.constant 0 : i32
    %c16_i32_2 = arith.constant 16 : i32
    %4 = arith.addi %c0_i32_1, %c16_i32_2 : i32
    %c1_i32 = arith.constant 1 : i32
    scf.for %arg11 = %c0_i32_1 to %4 step %c1_i32  : i32 {
      %8 = arith.addi %3, %arg11 : i32
      %9 = arith.index_cast %8 : i32 to index
      %10 = memref.load %arg2[%9] : memref<16xi32, #tpu.memory_space<smem>>
      %11 = arith.index_cast %8 : i32 to index
      %12 = memref.load %arg3[%11] : memref<16xi32, #tpu.memory_space<smem>>
      %13 = arith.index_cast %10 : i32 to index
      %c0 = arith.constant 0 : index
      %14 = vector.load %arg10[%13, %c0] : memref<16x256xf32, #tpu.memory_space<vmem>>, vector<1x256xf32>
      %15 = arith.index_cast %12 : i32 to index
      %c0_6 = arith.constant 0 : index
      %16 = vector.load %arg9[%15, %c0_6] : memref<16x128xf32, #tpu.memory_space<vmem>>, vector<1x128xf32>
      %17 = vector.extract_strided_slice %14 {offsets = [0, 0], sizes = [1, 128], strides = [1, 1]} : vector<1x256xf32> to vector<1x128xf32>
      %18 = arith.addf %16, %17 : vector<1x128xf32>
      %19 = arith.negf %18 : vector<1x128xf32>
      %20 = math.exp %19 : vector<1x128xf32>
      %cst = arith.constant 1.000000e+00 : f32
      %21 = vector.broadcast %cst : f32 to vector<1x128xf32>
      %22 = arith.addf %21, %20 : vector<1x128xf32>
      %23 = arith.divf %21, %22 : vector<1x128xf32>
      %24 = vector.extract_strided_slice %14 {offsets = [0, 128], sizes = [1, 128], strides = [1, 1]} : vector<1x256xf32> to vector<1x128xf32>
      %25 = arith.mulf %23, %24 : vector<1x128xf32>
      %26 = arith.index_cast %12 : i32 to index
      %c0_7 = arith.constant 0 : index
      %27 = vector.load %arg7[%26, %c0_7] : memref<16x128xf32, #tpu.memory_space<vmem>>, vector<1x128xf32>
      %28 = arith.addf %27, %25 : vector<1x128xf32>
      %29 = arith.index_cast %12 : i32 to index
      %c0_8 = arith.constant 0 : index
      %30 = vector.load %arg7[%29, %c0_8] : memref<16x128xf32, #tpu.memory_space<vmem>>, vector<1x128xf32>
      tpu.vector_store %arg7[%29, %c0_8], %28 {strides = array<i32>} : memref<16x128xf32, #tpu.memory_space<vmem>>, vector<1x128xf32>,
    }
    %c16_i32_3 = arith.constant 16 : i32
    %c0_i32_4 = arith.constant 0 : i32
    %5 = arith.cmpi eq, %arg1, %c0_i32_4 : i32
    %6 = arith.extui %5 : i1 to i32
    %c0_i32_5 = arith.constant 0 : i32
    %7 = arith.cmpi ne, %6, %c0_i32_5 : i32
    scf.if %7 {
      %c1_i32_6 = arith.constant 1 : i32
      %8 = arith.cmpi slt, %arg0, %c1_i32_6 : i32
      %9 = arith.extui %8 : i1 to i32
      %c0_i32_7 = arith.constant 0 : i32
      %10 = arith.cmpi ne, %9, %c0_i32_7 : i32
      scf.if %10 {
        %c0 = arith.constant 0 : index
        %c0_8 = arith.constant 0 : index
        %11 = vector.load %arg7[%c0, %c0_8] : memref<16x128xf32, #tpu.memory_space<vmem>>, vector<16x128xf32>
        %cst = arith.constant 0.000000e+00 : f32
        %12 = vector.broadcast %cst : f32 to vector<16x128xf32>
        %13 = arith.maximumf %11, %12 : vector<16x128xf32>
        %14 = arith.mulf %13, %13 : vector<16x128xf32>
        %cst_9 = arith.constant dense<0.000000e+00> : vector<16xf32>
        %15 = vector.multi_reduction <add>, %14, %cst_9 [1] : vector<16x128xf32> to vector<16xf32>
        %16 = vector.shape_cast %15 : vector<16xf32> to vector<16x1xf32>
        %cst_10 = arith.constant 1.000000e-24 : f32
        %17 = vector.broadcast %cst_10 : f32 to vector<16x1xf32>
        %18 = arith.maximumf %16, %17 : vector<16x1xf32>
        %19 = math.rsqrt %18 : vector<16x1xf32>
        %20 = vector.broadcast %19 : vector<16x1xf32> to vector<16x128xf32>
        %21 = arith.mulf %13, %20 : vector<16x128xf32>
        %c0_11 = arith.constant 0 : index
        %c0_12 = arith.constant 0 : index
        %22 = vector.load %arg8[%c0_11, %c0_12] : memref<16x128xf32, #tpu.memory_space<vmem>>, vector<16x128xf32>
        tpu.vector_store %arg8[%c0_11, %c0_12], %21 {strides = array<i32>} : memref<16x128xf32, #tpu.memory_space<vmem>>, vector<16x128xf32>,
      } else {
      }
    } else {
    }
    return
  }
  func.func @transform_0(%arg0: i32, %arg1: i32, %arg2: memref<16xi32, #tpu.memory_space<smem>>, %arg3: memref<16xi32, #tpu.memory_space<smem>>) -> (i32, i32) {
    %c0_i32 = arith.constant 0 : i32
    %c0_i32_0 = arith.constant 0 : i32
    %c0_i32_1 = arith.constant 0 : i32
    return %c0_i32, %c0_i32_0 : i32, i32
  }
  func.func @transform_1(%arg0: i32, %arg1: i32, %arg2: memref<16xi32, #tpu.memory_space<smem>>, %arg3: memref<16xi32, #tpu.memory_space<smem>>) -> (i32, i32, i32) {
    %c0_i32 = arith.constant 0 : i32
    %c0_i32_0 = arith.constant 0 : i32
    %c0_i32_1 = arith.constant 0 : i32
    return %arg0, %c0_i32, %c0_i32_0 : i32, i32, i32
  }
  func.func @transform_2(%arg0: i32, %arg1: i32, %arg2: memref<16xi32, #tpu.memory_space<smem>>, %arg3: memref<16xi32, #tpu.memory_space<smem>>) -> (i32, i32, i32) {
    %c0_i32 = arith.constant 0 : i32
    %c0_i32_0 = arith.constant 0 : i32
    %c0_i32_1 = arith.constant 0 : i32
    return %arg0, %c0_i32, %c0_i32_0 : i32, i32, i32
  }
  func.func @transform_3(%arg0: i32, %arg1: i32, %arg2: memref<16xi32, #tpu.memory_space<smem>>, %arg3: memref<16xi32, #tpu.memory_space<smem>>) -> (i32, i32) {
    %c0_i32 = arith.constant 0 : i32
    %c0_i32_0 = arith.constant 0 : i32
    %c0_i32_1 = arith.constant 0 : i32
    return %c0_i32, %c0_i32_0 : i32, i32
  }
}

</mosaic_0001>

<bundles_post_ra>
// kernel: tpu_custom_call.1
= control target key start
LH: loop header
LB: loop body
LE: loop exit
PB: predicated region body
PF: predicated region fallthrough
CT: control target
= control target key end

     0   :  { %s1392_s0 = inlined_call_operand.hbm [shape: s32[16], index: 0, kind: input, shape index: {}]   ;;  %s1393_s2 = inlined_call_operand.hbm [shape: f32[16,128], index: 2, kind: input, shape index: {}]   ;;  %s1394_s3 = inlined_call_operand.hbm [shape: bf16[2,128,512], index: 3, kind: input, shape index: {}]   ;;  %s1395_s4 = inlined_call_operand.vmem [shape: f32[2,1,512], index: 4, kind: input, shape index: {}]   ;;  %s1396_s5 = inlined_call_operand.hbm [shape: f32[16,128], index: 5, kind: output, shape index: {}]   ;;  %s1397_s1 = inlined_call_operand.vmem [shape: s32[16], index: 1, kind: input, shape index: {}]  }
   0x1   :  { %s921_s20 = scalar_lea.hbm %s1392_s0, 16 }
   0x2   :  { %p922_p0 = scmp.ne.s32.totalorder %s1392_s0, %s921_s20  ;;  %p925_p1 = scmp.lt.u32.totalorder %s921_s20, %s1392_s0 }
   0x4   :  { %p927_p2 = pnand %p925_p1, %p922_p0 }
   0x6   :  { %930 = shalt.err (!%p927_p2)  }
   0x7   :  { %s1097_s25 = smov [#allocation6]   ;;  %s12_s30 = sshll.u32 %s1397_s1, 4  ;;  %s13_s30 = int_to_ptr.vmem [resolvable:$true] %s12_s30 }
   0x8   :  { %11 = dma.hbm_to_smem %s1392_s0, 16, %s1097_s25, [#allocation5] }
   0x9   :  { %s931_s6 = scalar_lea.vmem %s13_s30, 16  ;;  %p936_p4 = scmp.lt.s32.totalorder %s13_s30, %s13_s30 }
   0xa   :  { %p932_p3 = scmp.ne.s32.totalorder %s13_s30, %s931_s6  ;;  %p937_p5 = scmp.lt.s32.totalorder %s931_s6, %s931_s6 }
   0xc   :  { %p938_p6 = por %p937_p5, %p936_p4 }
   0xe   :  { %p939_p7 = pnand %p938_p6, %p932_p3 }
  0x10   :  { %942 = shalt.err (!%p939_p7)  }
  0x11   :  { %s1098_s7 = smov [#allocation7]  }
  0x12   :  { %15 = dma.vmem_to_smem %s13_s30, 16, %s1098_s7, [#allocation5] }
  0x13   :  { %1055 = dma.done.wait [#allocation5], 32 }
  0x14   :  { %1056 = vsyncadd [#allocation5], 4294967264 }
  0x15   :  { %17 = sfence }
  0x16   :  { %18 = vsyncpa [#allocation9], 0 }
  0x17   :  { %19 = vsyncpa [#allocation12], 0 }
  0x18   :  { %21 = vsyncpa [#allocation12 + $0x1], 0 }
  0x19   :  { %22 = vsyncpa [#allocation10], 0  ;;  %s1154_s0 = smov 0   ;;  %s1156_s1 = smov 0  }
  0x1a   :  { %s1158_s8 = smov 0   ;;  %s1160_s9 = smov 0  }
  0x1b   :  { %s1162_s10 = smov 0   ;;  %s1164_s11 = smov 0  }
  0x1c LB: > { %s721_s12 = sadd.s32 4294967295, %s1091_s11   ;;  %p81_p8 = scmp.ne.s32.totalorder %s1075_s1, %s1071_s0  ;;  %s1091_s11 = sphi %s1164_s11, %s28_s11   ;;  %s1087_s10 = sphi %s1162_s10, %s1415_s10   ;;  %s1083_s9 = sphi %s1160_s9, %s1414_s9   ;;  %s1079_s8 = sphi %s1158_s8, %s1413_s8   ;;  %s1075_s1 = sphi %s1156_s1, %s1412_s1   ;;  %s1071_s0 = sphi %s1154_s0, %s1411_s0  }
  0x1d   : > { %p1186_p9 = scmp.eq.s32.totalorder %s721_s12, 0  ;;  %p722_p10 = scmp.ge.s32.totalorder %s1091_s11, 1 }
  0x1e   : > { %p139_p11 = scmp.lt.s32.totalorder %s1091_s11, 3  ;;  %s1099_s16 = smov [#allocation8]  }
  0x1f   : > { %s1402_s13 = scalar_select %p1186_p9, 1, 0 }
  0x20   : > { %p1194_p12 = por %p1186_p9, %p81_p8  ;;  %p1198_p13 = pnand %p722_p10, %p139_p11 }
  0x21   : > { %s151_s17 = sshll.u32 %s1099_s16, 4  ;;  %s40_s19 = sadd.s32 1, %s1087_s10  ;;  %s152_s17 = int_to_ptr.vmem [resolvable:$true] %s151_s17 }
  0x22   : > { %s1403_s14 = scalar_select %p1194_p12, 1, 0 }
  0x23   : > { %s1404_s15 = scalar_select %p1198_p13, 1, 0 }
  0x24   : > { %p785_p0 = pneg %p1198_p13  ;;  %s943_s22 = scalar_lea.hbm %s1393_s2, 256 }
  0x25   : > { %p944_p2 = scmp.ne.s32.totalorder %s1393_s2, %s943_s22  ;;  %p950_p6 = scmp.lt.u32.totalorder %s943_s22, %s1393_s2 }
  0x26   : > { %p1206_p1 = pnand %p785_p0, %p1186_p9 }
  0x28   : > { %p945_p3 = pneg %p1206_p1 }
  0x2a   : > { %p946_p4 = pnand %p945_p3, %p944_p2 }
  0x2c   : > { %p947_p5 = pneg %p946_p4 }
  0x2e   : > { %p952_p7 = pnand %p950_p6, %p947_p5 }
  0x30   : > { %955 = shalt.err (!%p952_p7)
}
  0x31   : > { %s956_s27 = scalar_lea.vmem %s152_s17, 256  ;;  %p964_p0 = scmp.lt.s32.totalorder %s152_s17, %s152_s17 }
  0x32   : > { %p957_p8 = scmp.ne.s32.totalorder %s152_s17, %s956_s27  ;;  %p965_p12 = scmp.lt.s32.totalorder %s956_s27, %s956_s27 }
  0x34   : > { %p959_p10 = pnand %p957_p8, %p945_p3  ;;  %p966_p9 = por %p965_p12, %p964_p0 }
  0x36   : > { %p960_p11 = pneg %p959_p10 }
  0x38   : > { %p967_p13 = pnand %p966_p9, %p960_p11 }
  0x3a   : > { %970 = shalt.err (!%p967_p13)
}
  0x3b   : > { %s1100_s28 = smov 128   ;;  %s1101_s29 = smov 8  }
  0x3c   : > { %788 = dma.hbm_to_vmem [thread:$0]  (!%p1206_p1), %s1393_s2, 256, %s152_s17, [#allocation9], %s1100_s28, %s1100_s28, %s1101_s29  }
  0x3d   : > { %p42_p12 = scmp.ge.s32.totalorder %s40_s19, 2  ;;  %s68_s7 = sadd.s32 1, %s1079_s8 }
  0x3e   : > { %p75_p9 = scmp.ne.s32.totalorder %s1079_s8, %s1075_s1  ;;  %p76_p13 = scmp.eq.s32.totalorder %s1091_s11, 0 }
  0x3f   : > { %s1417_s19 = smov (%p42_p12, %s40_s19), 0  ;;  %p794_p3 = scmp.lt.s32.totalorder %s1091_s11, 2 }
  0x40   : > { %p77_p2 = por %p76_p13, %p75_p9  ;;  %s65_s0 = ssub.s32 %s1087_s10, %s1417_s19 }
  0x41   : > { %s165_s16 = sand.u32 1, %s1079_s8   ;;  %p66_p4 = scmp.eq.s32.totalorder %s65_s0, 0 }
  0x42   : > { %s725_s20 = sshll.u32 %s165_s16, 8  ;;  %s773_s21 = sshll.u32 %s1087_s10, 12 }
  0x43   : > { %s1239_s22 = scalar_select %p66_p4, %s1079_s8, %s68_s7  }
  0x44   : > { %s1244_s17 = scalar_lea.hbm %s1394_s3, %s773_s21  ;;  %s169_s24 = scalar_lea.vmem [#allocation11], %s725_s20 }
  0x45   : > { %s176_s25 = sshll.u32 %s169_s24, 4  ;;  %p1246_p1 = pnand %p794_p3, %p77_p2  ;;  %s1250_s25 = int_to_ptr.vmem [resolvable:$true] %s176_s25 }
  0x46   : > { %s1252_s27 = scalar_lea.sflag [#allocation12], %s165_s16  ;;  %s971_s28 = scalar_lea.hbm %s1244_s17, 4096 }
  0x47   : > { %p972_p5 = scmp.ne.s32.totalorder %s1244_s17, %s971_s28  ;;  %p973_p6 = pneg %p1246_p1 }
  0x48   : > { %s976_s6 = scalar_lea.hbm %s1394_s3, 8192  ;;  %p977_p10 = scmp.lt.u32.totalorder %s1244_s17, %s1394_s3 }
  0x49   : > { %p974_p7 = pnand %p973_p6, %p972_p5  ;;  %p978_p11 = scmp.lt.u32.totalorder %s976_s6, %s971_s28 }
  0x4a   : > { %p980_p12 = scmp.lt.u32.totalorder %s971_s28, %s1244_s17 }
  0x4b   : > { %p975_p8 = pneg %p974_p7  ;;  %p979_p0 = por %p978_p11, %p977_p10 }
  0x4d   : > { %p981_p9 = por %p980_p12, %p979_p0 }
  0x4f   : > { %p982_p13 = pnand %p981_p9, %p975_p8 }
  0x51   : > { %985 = shalt.err (!%p982_p13)
}
  0x52   : > { %s986_s16 = scalar_lea.vmem %s1250_s25, 4096  ;;  %s1102_s20 = smov [#allocation11]  }
  0x53   : > { %p987_p2 = scmp.ne.s32.totalorder %s1250_s25, %s986_s16  ;;  %s991_s21 = sshll.u32 %s1102_s20, 4  ;;  %s992_s21 = int_to_ptr.vmem [resolvable:$false] %s991_s21 }
  0x54   : > { %s993_s18 = scalar_lea.vmem %s992_s21, 8192  ;;  %p994_p5 = scmp.lt.s32.totalorder %s1250_s25, %s992_s21 }
  0x55   : > { %p989_p3 = pnand %p987_p2, %p973_p6  ;;  %p995_p7 = scmp.lt.s32.totalorder %s993_s18, %s986_s16 }
  0x57   : > { %p990_p4 = pneg %p989_p3  ;;  %p996_p10 = por %p995_p7, %p994_p5 }
  0x59   : > { %p997_p11 = pnand %p996_p10, %p990_p4 }
  0x5b   : > { %1000 = shalt.err (!%p997_p11)
}
  0x5c   : > { %s1103_s23 = smov 256   ;;  %s1104_s24 = smov 16  }
  0x5d   : > { %792 = dma.hbm_to_vmem [thread:$0]  (!%p1246_p1), %s1244_s17, 4096, %s1250_s25, %s1252_s27, %s1103_s23, %s1103_s23, %s1104_s24  }
  0x5e   : > { %p1407_p6 = scmp.ne.s32.totalorder %s1404_s15, 0 }
  0x5f   : > { %p1408_p8 = scmp.ne.s32.totalorder (!%p1407_p6), %s1402_s13, 0 }
  0x60   : > { %195 = sbr.rel (%p1407_p6) target bundleno = 613 (0x265), region = 32 }
  0x67   : > { %1058 = dma.done.wait (%p1408_p8), [#allocation9], 256  }
  0x68   : > { %1060 = vsyncadd (%p1408_p8), [#allocation9], 4294967040  ;;  %s201_s28 = sand.u32 1, %s1075_s1   ;;  %p1409_p0 = scmp.ne.s32.totalorder %s1403_s14, 0 }
  0x69   : > { %s730_s29 = sshll.u32 %s201_s28, 8  ;;  %s202_s30 = scalar_lea.sflag [#allocation12], %s201_s28 }
  0x6a   : > { %s1287_s6 = scalar_lea.vmem [#allocation11], %s730_s29 }
  0x6b   : > { %1062 = dma.done.wait (%p1409_p0), %s202_s30, 4096  }
  0x6c   : > { %1064 = vsyncadd (%p1409_p0), %s202_s30, 4294963200  ;;  %p227_p1 = scmp.lt.s32.totalorder %s1083_s9, 1  ;;  %p732_p12 = scmp.ne.s32.totalorder %s1083_s9, 0 }
  0x6d   : > { %v240_v0 = vld [vmem:[#allocation8] sm:$0xff] (!%p732_p12)  ;;  %v241_v1 = vld [vmem:[#allocation8 + $0x8] sm:$0xff] (!%p732_p12) }
  0x6e   : > { %s228_s15 = scalar_select %p227_p1, %s1083_s9, 1 }
  0x6f   : > { %239 = sbr.rel (%p732_p12) target bundleno = 118 (0x76), region = 48  ;;  %242 = vst [vmem:[#allocation2] sm:$0xff] (!%p732_p12), %v240_v0  ;;  %243 = vst [vmem:[#allocation2 + $0x8] sm:$0xff] (!%p732_p12), %v241_v1 }
  0x70   : > { %s731_s17 = sshll.u32 %s228_s15, 2 }
  0x71   : > { %s1298_s26 = scalar_lea.vmem %s1395_s4, %s731_s17 }
  0x76 PF: > { %v865_v2 = vld [vmem:[%s1287_s6 + $0x4] ss:$16 sps:$4 sm:$0xff]   ;;  %v867_v3 = vld [vmem:[%s1287_s6 + $0xc] ss:$16 sps:$4 sm:$0xff]   ;;  %v1105_v4 = vmov 0   ;;  %v281_v38 = vlaneseq  ;;  %s1340_s14 = smov 0  }
  0x77   : > { %493 = vmatprep.mubr.bf16.mxu0 %v1105_v4  ;;  %536 = vmatprep.mubr.bf16.mxu1 %v1105_v4  ;;  %v869_v5 = vld [vmem:[%s1287_s6] ss:$16 sps:$4 sm:$0xff]   ;;  %v870_v6 = vld [vmem:[%s1287_s6 + $0x8] ss:$16 sps:$4 sm:$0xff]   ;;  %v871_v7 = vld [vmem:[%s1287_s6 + $0x24] ss:$16 sps:$4 sm:$0xff]  }
  0x78   : > { %461 = vmatprep.subr.bf16.mxu0 %v865_v2  ;;  %504 = vmatprep.subr.bf16.mxu1 %v867_v3  ;;  %v873_v8 = vld [vmem:[%s1287_s6 + $0x2c] ss:$16 sps:$4 sm:$0xff]   ;;  %v875_v9 = vld [vmem:[%s1287_s6 + $0x20] ss:$16 sps:$4 sm:$0xff]   ;;  %v876_v10 = vld [vmem:[%s1287_s6 + $0x28] ss:$16 sps:$4 sm:$0xff]  }
  0x79   : > { %462 = vmatpush1.bf16.msra.mxu0 %v869_v5  ;;  %505 = vmatpush1.bf16.msra.mxu1 %v870_v6  ;;  %v877_v11 = vld [vmem:[%s1287_s6 + $0x44] ss:$16 sps:$4 sm:$0xff]   ;;  %v879_v12 = vld [vmem:[%s1287_s6 + $0x4c] ss:$16 sps:$4 sm:$0xff]   ;;  %v881_v13 = vld [vmem:[%s1287_s6 + $0x40] ss:$16 sps:$4 sm:$0xff]  }
  0x7a   : > { %463 = vmatprep.subr.bf16.mxu0 %v871_v7  ;;  %506 = vmatprep.subr.bf16.mxu1 %v873_v8  ;;  %v882_v14 = vld [vmem:[%s1287_s6 + $0x48] ss:$16 sps:$4 sm:$0xff]   ;;  %v883_v15 = vld [vmem:[%s1287_s6 + $0x64] ss:$16 sps:$4 sm:$0xff]   ;;  %v885_v16 = vld [vmem:[%s1287_s6 + $0x6c] ss:$16 sps:$4 sm:$0xff]  }
  0x7b   : > { %v887_v17 = vld [vmem:[%s1287_s6 + $0x60] ss:$16 sps:$4 sm:$0xff]   ;;  %v888_v18 = vld [vmem:[%s1287_s6 + $0x68] ss:$16 sps:$4 sm:$0xff]   ;;  %v889_v19 = vld [vmem:[%s1287_s6 + $0x84] ss:$16 sps:$4 sm:$0xff]  }
  0x7c   : > { %v891_v20 = vld [vmem:[%s1287_s6 + $0x8c] ss:$16 sps:$4 sm:$0xff]   ;;  %v893_v21 = vld [vmem:[%s1287_s6 + $0x80] ss:$16 sps:$4 sm:$0xff]   ;;  %v894_v22 = vld [vmem:[%s1287_s6 + $0x88] ss:$16 sps:$4 sm:$0xff]  }
  0x7d   : > { %464 = vmatpush1.bf16.msra.mxu0 %v875_v9  ;;  %507 = vmatpush1.bf16.msra.mxu1 %v876_v10  ;;  %v895_v23 = vld [vmem:[%s1287_s6 + $0xa4] ss:$16 sps:$4 sm:$0xff]   ;;  %v897_v24 = vld [vmem:[%s1287_s6 + $0xac] ss:$16 sps:$4 sm:$0xff]   ;;  %v899_v25 = vld [vmem:[%s1287_s6 + $0xa0] ss:$16 sps:$4 sm:$0xff]  }
  0x7e   : > { %465 = vmatprep.subr.bf16.mxu0 %v877_v11  ;;  %508 = vmatprep.subr.bf16.mxu1 %v879_v12  ;;  %v900_v26 = vld [vmem:[%s1287_s6 + $0xa8] ss:$16 sps:$4 sm:$0xff]   ;;  %v901_v27 = vld [vmem:[%s1287_s6 + $0xc4] ss:$16 sps:$4 sm:$0xff]   ;;  %v903_v28 = vld [vmem:[%s1287_s6 + $0xcc] ss:$16 sps:$4 sm:$0xff]  }
  0x7f   : > { %v905_v29 = vld [vmem:[%s1287_s6 + $0xc0] ss:$16 sps:$4 sm:$0xff]   ;;  %v906_v30 = vld [vmem:[%s1287_s6 + $0xc8] ss:$16 sps:$4 sm:$0xff]   ;;  %v907_v31 = vld [vmem:[%s1287_s6 + $0xe4] ss:$16 sps:$4 sm:$0xff]  }
  0x80   : > { %v909_v32 = vld [vmem:[%s1287_s6 + $0xec] ss:$16 sps:$4 sm:$0xff]   ;;  %v911_v33 = vld [vmem:[%s1287_s6 + $0xe0] ss:$16 sps:$4 sm:$0xff]   ;;  %v912_v34 = vld [vmem:[%s1287_s6 + $0xe8] ss:$16 sps:$4 sm:$0xff]  }
  0x81   : > { %466 = vmatpush1.bf16.msra.mxu0 %v881_v13  ;;  %509 = vmatpush1.bf16.msra.mxu1 %v882_v14  ;;  %v244_v35 = vld [vmem:[#allocation2] sm:$0xff]  ;;  %v245_v36 = vld [vmem:[#allocation2 + $0x8] sm:$0xff]  ;;  %v1333_v39 = vshrl.u32 %v281_v38, 7  ;;  %v279_v42 = vld [vmem:[%s1298_s26] sm:$0xf] }
  0x82   : > { %467 = vmatprep.subr.bf16.mxu0 %v883_v15  ;;  %510 = vmatprep.subr.bf16.mxu1 %v885_v16  ;;  %v246_v37 = vpack.c.bf16 %v245_v36, %v244_v35 }
  0x83   : > { %v283_v40 = vsub.s32 0, %v1333_v39  ;;  %v291_v41 = vsub.s32 2, %v1333_v39  ;;  %v287_v43 = vsub.s32 1, %v1333_v39  ;;  %v295_v44 = vsub.s32 3, %v1333_v39 }
  0x85   : > { %468 = vmatpush1.bf16.msra.mxu0 %v887_v17  ;;  %511 = vmatpush1.bf16.msra.mxu1 %v888_v18  ;;  %v284_v45 = vrot.slane %v279_v42, %v283_v40  ;;  %v292_v46 = vrot.slane %v279_v42, %v291_v41  ;;  %v288_v47 = vrot.slane %v279_v42, %v287_v43 }
  0x86   : > { %469 = vmatprep.subr.bf16.mxu0 %v889_v19  ;;  %512 = vmatprep.subr.bf16.mxu1 %v891_v20  ;;  %v296_v48 = vrot.slane %v279_v42, %v295_v44 }
  0x89   : > { %470 = vmatpush1.bf16.msra.mxu0 %v893_v21  ;;  %513 = vmatpush1.bf16.msra.mxu1 %v894_v22 }
  0x8a   : > { %471 = vmatprep.subr.bf16.mxu0 %v895_v23  ;;  %514 = vmatprep.subr.bf16.mxu1 %v897_v24 }
  0x8d   : > { %472 = vmatpush1.bf16.msra.mxu0 %v899_v25  ;;  %515 = vmatpush1.bf16.msra.mxu1 %v900_v26 }
  0x8e   : > { %473 = vmatprep.subr.bf16.mxu0 %v901_v27  ;;  %516 = vmatprep.subr.bf16.mxu1 %v903_v28 }
  0x91   : > { %474 = vmatpush1.bf16.msra.mxu0 %v905_v29  ;;  %517 = vmatpush1.bf16.msra.mxu1 %v906_v30 }
  0x92   : > { %475 = vmatprep.subr.bf16.mxu0 %v907_v31  ;;  %518 = vmatprep.subr.bf16.mxu1 %v909_v32 }
  0x95   : > { %476 = vmatpush1.bf16.msra.mxu0 %v911_v33  ;;  %519 = vmatpush1.bf16.msra.mxu1 %v912_v34 }
  0x98   : > { %494 = vmatmul.mubr.bf16.vlgmr.msra.gmra.mrb[0].mxu0 %v246_v37  ;;  %537 = vmatmul.mubr.bf16.vlgmr.msra.gmra.mrb[0].mxu1 %v246_v37 }
 0x16b   : > { %v495_v49 = vpop.f32.mrb[0].mxu0  ;;  %v538_v50 = vpop.f32.mrb[0].mxu1 }
 0x16c   : > { %v496_v51 = vadd.f32 %v495_v49, %v284_v45  ;;  %v539_v52 = vadd.f32 %v538_v50, %v292_v46  ;;  %v497_v53 = vpop.f32.mrb[1].mxu0  ;;  %v540_v54 = vpop.f32.mrb[1].mxu1 }
 0x16d   : > { %v498_v55 = vadd.f32 %v497_v53, %v288_v47  ;;  %v541_v56 = vadd.f32 %v540_v54, %v296_v48  ;;  %v499_v57 = vpop.f32.mrb[2].mxu0  ;;  %v542_v58 = vpop.f32.mrb[2].mxu1 }
 0x16e   : > { %547 = vst [vmem:[#allocation3] sm:$0xff] %v496_v51  ;;  %550 = vst [vmem:[#allocation4 + $0x8] sm:$0xff] %v539_v52  ;;  %v500_v59 = vadd.f32 %v499_v57, %v284_v45  ;;  %v543_v60 = vadd.f32 %v542_v58, %v292_v46  ;;  %v501_v61 = vpop.f32.mrb[3].mxu0  ;;  %v544_v62 = vpop.f32.mrb[3].mxu1 }
 0x16f   : > { %549 = vst [vmem:[#allocation4] sm:$0xff] %v498_v55  ;;  %553 = vst [vmem:[#allocation13] sm:$0xff] %v541_v56  ;;  %v502_v63 = vadd.f32 %v501_v61, %v288_v47  ;;  %v545_v0 = vadd.f32 %v544_v62, %v296_v48 }
 0x170   : > { %548 = vst [vmem:[#allocation3 + $0x8] sm:$0xff] %v500_v59  ;;  %552 = vst [vmem:[#allocation4 + $0x18] sm:$0xff] %v543_v60 }
 0x171   : > { %551 = vst [vmem:[#allocation4 + $0x10] sm:$0xff] %v502_v63  ;;  %554 = vst [vmem:[#allocation13 + $0x8] sm:$0xff] %v545_v0 }
 0x172 LB: >> { %s563_s27 = sld [smem:[#allocation6 + %s1095_s14]]  ;;  %s1095_s14 = sphi %s1340_s14, %s561_s14  }
 0x173   : >> { %s564_s7 = sld [smem:[#allocation7 + %s1095_s14]]  ;;  %s561_s14 = sadd.s32 1, %s1095_s14  }
 0x174   : >> { %p558_p9 = scmp.ge.s32.totalorder %s561_s14, 16  }
 0x175   : > { %p768_p13 = scmp.ge.s32.totalorder (%p558_p9), %s1083_s9, 1 }
 0x178   : >> { %s565_s0 = sshra.s32 %s563_s27, 3  ;;  %s568_s16 = sand.u32 7, %s563_s27 }
 0x179   : >> { %s774_s20 = sshll.u32 %s565_s0, 4  ;;  %s574_s18 = scalar_lea.vmem [#allocation3], %s564_s7 }
 0x17a   : >> { %s571_s21 = sadd.s32 %s774_s20, %s568_s16  ;;  %v575_v1 = vld [vmem:[%s574_s18] sm:$0x1]  ;;  %s590_s24 = scalar_lea.vmem [#allocation13], %s564_s7 }
 0x17b   : >> { %s572_s23 = scalar_lea.vmem [#allocation4], %s571_s21  ;;  %v591_v9 = vld [vmem:[%s590_s24] sm:$0x1] }
 0x17c   : >> { %v573_v2 = vld [vmem:[%s572_s23] ss:$8 sm:$0x3] }
 0x17d   : >> { %v576_v3 = vadd.f32 %v575_v1, %v573_v2  ;;  %v587_v7 = vrot.slane %v573_v2, %v287_v43 }
 0x17f   : >> { %v767_v4 = vmul.f32 -1.442695, %v576_v3 }
 0x181   : >> { %913 = vpow2.f32 %v767_v4 }
 0x18b   : >> { %v914_v5 = vpop.eup %913 }
 0x18c   : >> { %v580_v6 = vadd.f32 1.0, %v914_v5 }
 0x18e   : >> { %915 = vrcp.f32 %v580_v6 }
 0x197   : > { %560 = sbr.rel (!%p558_p9) target bundleno = 370 (0x172), region = 103 }
 0x198   : >> { %v916_v8 = vpop.eup %915 }
 0x199   : >> { %v589_v10 = vmul.f32 %v916_v8, %v587_v7 }
 0x19b   : >> { %v592_v11 = vadd.f32 %v591_v9, %v589_v10 }
 0x19d   : >> { %593 = vst [vmem:[%s590_s24] sm:$0x1] %v592_v11 }
 0x19e   : > { %600 = sbr.rel (%p768_p13) target bundleno = 587 (0x24b), region = 63 }
 0x1a4   : > { %v601_v12 = vld [vmem:[#allocation13] sm:$0xff] (!%p768_p13)  ;;  %v602_v13 = vld [vmem:[#allocation13 + $0x8] sm:$0xff] (!%p768_p13) }
 0x1a5   : > { %v603_v14 = vmax.f32 %v601_v12, 0.0  ;;  %v604_v15 = vmax.f32 %v602_v13, 0.0 }
 0x1a7   : > { %v605_v16 = vmul.f32 %v603_v14, %v603_v14  ;;  %v606_v17 = vmul.f32 %v604_v15, %v604_v15 }
 0x1a9   : > { %607 = vadd.xlane.f32.xlu0 %v605_v16 }
 0x1ad   : > { %609 = vadd.xlane.f32.xlu0 %v606_v17 }
 0x236   : > { %v608_v18 = vpop.xlane.xlu0 %607 }
 0x237   : > { %v611_v19 = vmax.f32 %v608_v18, 1e-24 }
 0x239   : > { %917 = vrsqrt.f32 %v611_v19 }
 0x23a   : > { %v610_v20 = vpop.xlane.xlu0 %609 }
 0x23b   : > { %v612_v21 = vmax.f32 %v610_v20, 1e-24 }
 0x23d   : > { %919 = vrsqrt.f32 %v612_v21 }
 0x243   : > { %v918_v22 = vpop.eup %917 }
 0x244   : > { %v615_v23 = vmul.f32 %v918_v22, %v603_v14 }
 0x246   : > { %617 = vst [vmem:[#allocation2] sm:$0xff] %v615_v23 }
 0x247   : > { %v920_v24 = vpop.eup %919 }
 0x248   : > { %v616_v25 = vmul.f32 %v920_v24, %v604_v15 }
 0x24a   : > { %618 = vst [vmem:[#allocation2 + $0x8] sm:$0xff] %v616_v25 }
 0x24b PF: > { %p1348_p2 = scmp.eq.s32.totalorder %s721_s12, 1  ;;  %s1106_s28 = smov [#allocation13]  }
 0x24c   : > { %s625_s29 = sshll.u32 %s1106_s28, 4  ;;  %s626_s29 = int_to_ptr.vmem [resolvable:$true] %s625_s29 }
 0x24d   : > { %s1001_s30 = scalar_lea.vmem %s626_s29, 256  ;;  %p1008_p7 = scmp.lt.s32.totalorder %s626_s29, %s626_s29 }
 0x24e   : > { %p1002_p3 = scmp.ne.s32.totalorder %s626_s29, %s1001_s30  ;;  %p1009_p10 = scmp.lt.s32.totalorder %s1001_s30, %s1001_s30 }
 0x250   : > { %p1003_p4 = pnand %p1002_p3, %p1348_p2  ;;  %p1010_p11 = por %p1009_p10, %p1008_p7 }
 0x252   : > { %p1004_p5 = pneg %p1003_p4 }
 0x254   : > { %p1011_p6 = pnand %p1010_p11, %p1004_p5 }
 0x256   : > { %1014 = shalt.err (!%p1011_p6)
}
 0x257   : > { %s1015_s12 = scalar_lea.hbm %s1396_s5, 256 }
 0x258   : > { %p1016_p8 = scmp.ne.s32.totalorder %s1396_s5, %s1015_s12  ;;  %p1021_p12 = scmp.lt.u32.totalorder %s1015_s12, %s1396_s5 }
 0x25a   : > { %p1017_p0 = pnand %p1016_p8, %p1348_p2 }
 0x25c   : > { %p1018_p1 = pneg %p1017_p0 }
 0x25e   : > { %p1023_p9 = pnand %p1021_p12, %p1018_p1 }
 0x260   : > { %1026 = shalt.err (!%p1023_p9)
}
 0x261   : > { %s1107_s14 = smov 128   ;;  %s1108_s27 = smov 8  }
 0x262   : > { %782 = dma.vmem_to_hbm [thread:$0]  (%p1348_p2), %s626_s29, 256, %s1396_s5, [#allocation10], %s1107_s14, %s1107_s14, %s1108_s27  }
 0x263   : > { %1066 = dma.done.wait (%p1348_p2), [#allocation10], 256  }
 0x264   : > { %1068 = vsyncadd (%p1348_p2), [#allocation10], 4294967040 }
 0x265 PF: > { %s28_s11 = sadd.s32 1, %s1091_s11   ;;  %s1411_s0 = smov %s1075_s1 }
 0x266   : > { %p25_p13 = scmp.ge.s32.totalorder %s28_s11, 4   ;;  %s1412_s1 = smov %s1079_s8 }
 0x267   : > { %s1413_s8 = smov %s1239_s22  ;;  %s1414_s9 = smov %s1087_s10 }
 0x268   : > { %s1415_s10 = smov %s1417_s19  ;;  %27 = sbr.rel (!%p25_p13) target bundleno = 28 (0x1c), region = 114 }
 0x26f   :  { %641 = vsyncpa [#allocation9], 1 }
 0x270   :  { %643 = vsyncpa [#allocation9 + $0x1], 1 }
 0x271   :  { %644 = vsyncpa [#allocation12], 1 }
 0x272   :  { %646 = vsyncpa [#allocation12 + $0x1], 1 }
 0x273   :  { %647 = vsyncpa [#allocation10], 1 }
 0x274   :  { %649 = vsyncpa [#allocation10 + $0x1], 1 }

</bundles_post_ra>
